<compile_context>
chip_gen: v7x
topology: tpu7x:2x2x1
jax: 0.10.0
libtpu: 0.0.40
codegen_flags: <defaults>
</compile_context>

<pallas_src>
import jax
import jax.numpy as jnp
from jax.experimental import pallas as pl
from jax.experimental.pallas import tpu as pltpu

_LANE_CANDIDATES = (8192, 4096, 2048, 1024, 512, 256, 128)
_TARGET_BLOCK_BYTES = 8 * 1024 * 1024   # ~8 MiB per x block (~32 MiB dbl-buffered in+out)
_MIN_PALLAS_BYTES = 1 * 1024 * 1024     # below this, plain XLA is faster than a kernel launch


def _scaler_kernel(factor_ref, x_ref, o_ref):
    # factor_ref: (1,) f32 in SMEM (scalar prefetch; sigmoid/sqrt already folded in).
    # Multiply in f32 and cast on store: matches the f32-multiply-then-cast
    # reference for low-precision inputs; extra converts ride in spare VPU
    # slots of a DMA-bound kernel.
    o_ref[...] = (x_ref[...].astype(jnp.float32) * factor_ref[0]).astype(o_ref.dtype)


def _sublane_granularity(dtype):
    # Sub-32-bit dtypes pack along sublanes: (8,128) f32, (16,128) bf16, (32,128) int8.
    return {4: 8, 2: 16, 1: 32}.get(jnp.dtype(dtype).itemsize, 8)


def _round_up(a, b):
    return -(-a // b) * b


def _scale_factor(theta, tau, shift):
    s = jax.nn.sigmoid(theta.astype(jnp.float32).reshape(-1)[0]) * jnp.float32(tau)
    scale = (jnp.float32(1.0) - s) if shift else s
    return jnp.sqrt(scale)  # f32 scalar


def _pallas_scale_2d(x2d, factor_arr):
    """Multiply a lane-dense [rows, lanes] slab by a scalar via Pallas."""
    rows, lanes = x2d.shape
    dtype = x2d.dtype
    itemsize = jnp.dtype(dtype).itemsize
    sub = _sublane_granularity(dtype)

    # Row tile sized for ~_TARGET_BLOCK_BYTES, multiple of the sublane granularity.
    target_rows = max(sub, (_TARGET_BLOCK_BYTES // (lanes * itemsize)) // sub * sub)
    row_tile = min(rows, target_rows)
    # Give the grid >= 2 steps whenever rows allow it, so the "parallel" axis
    # can shard across v7x's two TensorCores (no effect on single-TC v5e/v6e).
    if rows > sub:
        row_tile = min(row_tile, _round_up(-(-rows // 2), sub))
    if row_tile < rows:
        row_tile = max(sub, (row_tile // sub) * sub)
    else:
        row_tile = rows
    grid = (-(-rows // row_tile),)

    # Double-buffered input + output + headroom; stays well inside v7x's
    # 64 MiB physical VMEM (and trivially inside v5e/v6e's 128 MiB).
    block_bytes = row_tile * lanes * itemsize
    vmem_limit = min(48 * 1024 * 1024,
                     max(16 * 1024 * 1024, 4 * block_bytes + (4 << 20)))

    n = rows * lanes
    return pl.pallas_call(
        _scaler_kernel,
        out_shape=jax.ShapeDtypeStruct((rows, lanes), dtype),
        grid_spec=pltpu.PrefetchScalarGridSpec(
            num_scalar_prefetch=1,
            grid=grid,
            in_specs=[pl.BlockSpec((row_tile, lanes), lambda i, f_ref: (i, 0))],
            out_specs=pl.BlockSpec((row_tile, lanes), lambda i, f_ref: (i, 0)),
        ),
        compiler_params=pltpu.CompilerParams(
            dimension_semantics=("parallel",),
            vmem_limit_bytes=vmem_limit,
        ),
        cost_estimate=pl.CostEstimate(
            flops=n, transcendentals=0, bytes_accessed=2 * n * itemsize),
    )(factor_arr, x2d)


def scaler_forward(x, theta, *, tau=0.5, shift=False,
                   min_pallas_bytes=_MIN_PALLAS_BYTES):
    """x: any-shape array (e.g. NCHW latents). theta: shape (1,) f32 parameter."""
    orig_shape = x.shape
    dtype = x.dtype
    itemsize = jnp.dtype(dtype).itemsize
    n = x.size

    factor = _scale_factor(theta, tau, shift)  # f32 scalar, theta never enters VMEM

    sub = _sublane_granularity(dtype)
    min_tile = sub * 128

    # Small-input fast path: kernel launch + pipeline prologue dwarfs the work.
    if n * itemsize < min_pallas_bytes or n < min_tile:
        return (x.astype(jnp.float32) * factor).astype(dtype).reshape(orig_shape)

    flat = x.reshape(-1)
    n_aligned = (n // min_tile) * min_tile

    head = flat if n_aligned == n else flat[:n_aligned]

    # Lane-dense layout: widest lane dim that divides the aligned length.
    lanes = 128
    for c in _LANE_CANDIDATES:
        if n_aligned % c == 0:
            lanes = c
            break
    head2d = head.reshape(n_aligned // lanes, lanes)

    out_head = _pallas_scale_2d(head2d, factor.reshape(1)).reshape(-1)

    if n_aligned == n:
        return out_head.reshape(orig_shape)

    # Tiny ragged tail (< sublane*128 elements): plain XLA multiply.
    tail = flat[n_aligned:]
    out_tail = (tail.astype(jnp.float32) * factor).astype(dtype)
    return jnp.concatenate([out_head, out_tail]).reshape(orig_shape)


def scaler_reference(x, theta, *, tau=0.5, shift=False):
    s = jax.nn.sigmoid(theta.astype(jnp.float32))[0] * tau
    scale = (1.0 - s) if shift else s
    return (x.astype(jnp.float32) * jnp.sqrt(scale)).astype(x.dtype)


if __name__ == "__main__":
    key = jax.random.PRNGKey(0)
    k1, k2, k3 = jax.random.split(key, 3)

    tau = 0.5
    theta = jnp.zeros((1,), dtype=jnp.float32)  # nn.Parameter(torch.zeros(1))

    # (a) Small VAE-latent-sized input: exercises the XLA fast path.
    x_small = jax.random.normal(k1, (2, 4, 16, 16), dtype=jnp.float32)
    out_small = scaler_forward(x_small, theta, tau=tau, shift=False)
    out_small_shift = scaler_forward(x_small, theta, tau=tau, shift=True)

    # (b) Same input forced through the Pallas kernel path.
    out_pallas = scaler_forward(x_small, theta, tau=tau, shift=False, min_pallas_bytes=0)
    out_pallas_shift = scaler_forward(x_small, theta, tau=tau, shift=True, min_pallas_bytes=0)

    # (c) Ragged size: multi-step grid + aligned-prefix / XLA-tail path.
    x_ragged = jax.random.normal(k2, (1, 1, 73, 131), dtype=jnp.float32)
    out_ragged = scaler_forward(x_ragged, theta, tau=tau, shift=False, min_pallas_bytes=0)

    # (d) bf16 input through the Pallas path (f32 math in-kernel).
    x_bf16 = jax.random.normal(k3, (2, 4, 16, 16), dtype=jnp.bfloat16)
    out_bf16 = scaler_forward(x_bf16, theta, tau=tau, shift=False, min_pallas_bytes=0)

    for o in (out_small, out_small_shift, out_pallas, out_pallas_shift, out_ragged, out_bf16):
        jax.block_until_ready(o)

    assert out_small.shape == x_small.shape and out_small.dtype == x_small.dtype
    assert jnp.allclose(out_small, scaler_reference(x_small, theta, tau=tau, shift=False),
                        atol=1e-6, rtol=1e-6)
    assert jnp.allclose(out_small_shift, scaler_reference(x_small, theta, tau=tau, shift=True),
                        atol=1e-6, rtol=1e-6)
    assert jnp.allclose(out_pallas, scaler_reference(x_small, theta, tau=tau, shift=False),
                        atol=1e-6, rtol=1e-6)
    assert jnp.allclose(out_pallas_shift, scaler_reference(x_small, theta, tau=tau, shift=True),
                        atol=1e-6, rtol=1e-6)
    assert out_ragged.shape == x_ragged.shape
    assert jnp.allclose(out_ragged, scaler_reference(x_ragged, theta, tau=tau, shift=False),
                        atol=1e-6, rtol=1e-6)
    assert out_bf16.shape == x_bf16.shape and out_bf16.dtype == jnp.bfloat16
    assert jnp.allclose(out_bf16.astype(jnp.float32),
                        scaler_reference(x_bf16, theta, tau=tau, shift=False).astype(jnp.float32),
                        atol=1e-2, rtol=1e-2)

    print("KERNEL_OK")
</pallas_src>

<mosaic_0001>
module attributes {stable_mosaic.version = 11 : i64} {
  func.func @_scaler_kernel(%arg0: i32, %arg1: memref<1xf32, #tpu.memory_space<smem>>, %arg2: memref<1x2048xf32, #tpu.memory_space<vmem>>, %arg3: memref<1x2048xf32, #tpu.memory_space<vmem>>) attributes {dimension_semantics = [#tpu.dimension_semantics<parallel>], iteration_bounds = array<i64: 1>, scalar_prefetch = 1 : i64, scratch_operands = 0 : i64, tpu.core_type = #tpu.core_type<tc>, window_params = [{transform_indices = @transform_0, window_bounds = array<i64: 1, 2048>}, {transform_indices = @transform_1, window_bounds = array<i64: 1, 2048>}]} {
    %c0 = arith.constant 0 : index
    %c0_0 = arith.constant 0 : index
    %0 = vector.load %arg2[%c0, %c0_0] : memref<1x2048xf32, #tpu.memory_space<vmem>>, vector<1x2048xf32>
    %c0_1 = arith.constant 0 : index
    %1 = memref.load %arg1[%c0_1] : memref<1xf32, #tpu.memory_space<smem>>
    %2 = vector.broadcast %1 : f32 to vector<1x2048xf32>
    %3 = arith.mulf %0, %2 : vector<1x2048xf32>
    %c0_2 = arith.constant 0 : index
    %c0_3 = arith.constant 0 : index
    %4 = vector.load %arg3[%c0_2, %c0_3] : memref<1x2048xf32, #tpu.memory_space<vmem>>, vector<1x2048xf32>
    tpu.vector_store %arg3[%c0_2, %c0_3], %3 {strides = array<i32>} : memref<1x2048xf32, #tpu.memory_space<vmem>>, vector<1x2048xf32>,
    return
  }
  func.func @transform_0(%arg0: i32, %arg1: memref<1xf32, #tpu.memory_space<smem>>) -> (i32, i32) {
    %c0_i32 = arith.constant 0 : i32
    %c0_i32_0 = arith.constant 0 : i32
    return %arg0, %c0_i32 : i32, i32
  }
  func.func @transform_1(%arg0: i32, %arg1: memref<1xf32, #tpu.memory_space<smem>>) -> (i32, i32) {
    %c0_i32 = arith.constant 0 : i32
    %c0_i32_0 = arith.constant 0 : i32
    return %arg0, %c0_i32 : i32, i32
  }
}

</mosaic_0001>

<bundles_post_ra>
// kernel: tpu_custom_call.1
= control target key start
LH: loop header
LB: loop body
LE: loop exit
PB: predicated region body
PF: predicated region fallthrough
CT: control target
= control target key end

     0   :  { %8 = vsyncpa [#allocation5], 0  ;;  %s140_s0 = inlined_call_operand.<no memory space> [shape: f32[1], index: 0, kind: input, shape index: {}]   ;;  %s141_s1 = inlined_call_operand.hbm [shape: f32[1,2048], index: 1, kind: input, shape index: {}]   ;;  %s142_s2 = inlined_call_operand.hbm [shape: f32[1,2048], index: 2, kind: output, shape index: {}]  }
   0x1   :  { %9 = vsyncpa [#allocation6], 0  ;;  %s96_s9 = smov [#allocation4]   ;;  %s48_s13 = scalar_lea.hbm %s141_s1, 256 }
   0x2   :  { %s16_s10 = sshll.u32 %s96_s9, 4  ;;  %p49_p0 = scmp.ne.s32.totalorder %s141_s1, %s48_s13  ;;  %s17_s10 = int_to_ptr.vmem [resolvable:$true] %s16_s10 }
   0x3   :  { %p52_p1 = scmp.lt.u32.totalorder %s48_s13, %s141_s1 }
   0x5   :  { %p54_p2 = pnand %p52_p1, %p49_p0 }
   0x7   :  { %57 = shalt.err (!%p54_p2)
}
   0x8   :  { %s58_s18 = scalar_lea.vmem %s17_s10, 256  ;;  %p63_p4 = scmp.lt.s32.totalorder %s17_s10, %s17_s10 }
   0x9   :  { %p59_p3 = scmp.ne.s32.totalorder %s17_s10, %s58_s18  ;;  %p64_p5 = scmp.lt.s32.totalorder %s58_s18, %s58_s18 }
   0xb   :  { %p65_p6 = por %p64_p5, %p63_p4 }
   0xd   :  { %p66_p7 = pnand %p65_p6, %p59_p3 }
   0xf   :  { %69 = shalt.err (!%p66_p7)
}
  0x10   :  { %19 = dma.hbm_to_vmem [thread:$0]  %s141_s1, 256, %s17_s10, [#allocation5]  }
  0x11   :  { %92 = dma.done.wait [#allocation5], 256  }
  0x12   :  { %93 = vsyncadd [#allocation5], 4294967040  ;;  %v26_v0 = vstv %s140_s0  ;;  %s97_s23 = smov [#allocation7]   ;;  %v23_v1 = vld [vmem:[#allocation4] sm:$0xff]  ;;  %v24_v2 = vld [vmem:[#allocation4 + $0x8] sm:$0xff] }
  0x13   :  { %s37_s24 = sshll.u32 %s97_s23, 4  ;;  %v27_v3 = vmul.f32 %v26_v0, %v23_v1  ;;  %v28_v4 = vmul.f32 %v26_v0, %v24_v2  ;;  %s38_s24 = int_to_ptr.vmem [resolvable:$true] %s37_s24 }
  0x14   :  { %s70_s25 = scalar_lea.vmem %s38_s24, 256  ;;  %p75_p9 = scmp.lt.s32.totalorder %s38_s24, %s38_s24 }
  0x15   :  { %29 = vst [vmem:[#allocation7] sm:$0xff] %v27_v3  ;;  %30 = vst [vmem:[#allocation7 + $0x8] sm:$0xff] %v28_v4  ;;  %p71_p8 = scmp.ne.s32.totalorder %s38_s24, %s70_s25  ;;  %p76_p10 = scmp.lt.s32.totalorder %s70_s25, %s70_s25 }
  0x17   :  { %p77_p11 = por %p76_p10, %p75_p9 }
  0x19   :  { %p78_p12 = pnand %p77_p11, %p71_p8 }
  0x1b   :  { %81 = shalt.err (!%p78_p12)
}
  0x1c   :  { %s82_s0 = scalar_lea.hbm %s142_s2, 256 }
  0x1d   :  { %p83_p13 = scmp.ne.s32.totalorder %s142_s2, %s82_s0  ;;  %p86_p0 = scmp.lt.u32.totalorder %s82_s0, %s142_s2 }
  0x1f   :  { %p88_p1 = pnand %p86_p0, %p83_p13 }
  0x21   :  { %91 = shalt.err (!%p88_p1)
}
  0x22   :  { %40 = dma.vmem_to_hbm [thread:$0]  %s38_s24, 256, %s142_s2, [#allocation6]  }
  0x23   :  { %94 = dma.done.wait [#allocation6], 256  }
  0x24   :  { %95 = vsyncadd [#allocation6], 4294967040 }
  0x25   :  { %44 = vsyncpa [#allocation5], 1 }
  0x26   :  { %45 = vsyncpa [#allocation6], 1 }

</bundles_post_ra>
